<compile_context>
chip_gen: v7x
topology: tpu7x:2x2x1
jax: 0.10.0
libtpu: 0.0.40
codegen_flags: <defaults>
</compile_context>

<pallas_src>
import functools
from typing import NamedTuple, Optional

import jax
import jax.numpy as jnp
from jax.experimental import pallas as pl
from jax.experimental.pallas import tpu as pltpu


def _round_up(v: int, m: int) -> int:
    return (v + m - 1) // m * m


def _vmem_capacity_bytes() -> int:
    try:
        info = pltpu.get_tpu_info()
        cap = int(getattr(info, "vmem_capacity_bytes", 0) or 0)
        if cap > 0:
            return cap
    except Exception:
        pass
    return 128 * 1024 * 1024  # conservative fallback (v5e/v6e-sized)


def _pick_tf(d_ff_p: int, target: int) -> int:
    """Largest multiple of 128 that divides d_ff_p and is <= target."""
    t = max(128, (min(target, d_ff_p) // 128) * 128)
    while t > 128:
        if d_ff_p % t == 0:
            return t
        t -= 128
    return 128


def _footprint_bytes(tm, tf, d_model, x_isz, w_isz, o_isz, use_scratch):
    # Double-buffered tiles + accumulator + rough f32 intermediates.
    return (2 * tm * d_model * x_isz            # x tile
            + 2 * d_model * (2 * tf) * w_isz    # fused [W1|W3] tile
            + 2 * tf * d_model * w_isz          # W2 tile
            + 2 * tm * d_model * o_isz          # output tile
            + (tm * d_model * 4 if use_scratch else 0)
            + 4 * tm * tf * 4)                  # h13 / gate intermediates


class FFNPlan(NamedTuple):
    d_model: int
    d_ff: int
    d_ff_p: int
    tm: int
    tf: int
    resident: bool
    sub: int
    vmem_budget: int
    two_core_chip: bool
    compute_dtype: Optional[str]


def make_ffn_plan(d_model, d_ff, *, x_dtype, w_dtype,
                  tm=None, tf=None, resident=None, compute_dtype=None):
    """Static (Python-int) tiling plan; hashable so it can be a jit static arg."""
    cap = _vmem_capacity_bytes()
    budget = int(cap * 0.85)                 # generation-aware VMEM cap
    two_core = cap <= 64 * 1024 * 1024       # v7x-like: 64 MiB/TC, 2 TCs/chip

    cdt = jnp.dtype(compute_dtype) if compute_dtype is not None else None
    x_isz = (cdt or jnp.dtype(x_dtype)).itemsize
    w_isz = (cdt or jnp.dtype(w_dtype)).itemsize
    o_isz = jnp.dtype(x_dtype).itemsize      # output keeps the input dtype
    use_scratch = jnp.dtype(x_dtype) != jnp.dtype(jnp.float32)
    sub = 16 if x_isz == 2 else 8            # bf16 packs 16 rows per vreg

    if tm is None:
        # v7x roofline (~311 FLOP/weight byte) is covered by ~512 token rows;
        # v6e needs ~650 FLOP/byte and has 128 MiB VMEM -> bigger tile.
        tm = 512 if two_core else 768
    tm = max(sub, _round_up(tm, sub))

    # Fully-resident fast path if the fused weights (double-buffered) leave
    # room for the activation tiles.
    w_resident_bytes = 2 * 3 * d_model * d_ff * w_isz
    if resident is None:
        resident = w_resident_bytes <= int(0.55 * budget)

    if resident:
        d_ff_p, tf_eff = d_ff, d_ff
    else:
        if tf is None:
            d_ff_p = _round_up(d_ff, 128)
            target = 512 if two_core else 1024
            tf_eff = _pick_tf(d_ff_p, target)
        else:
            tf_eff = max(128, _round_up(tf, 128))
            d_ff_p = _round_up(d_ff, tf_eff)

    # Shrink the token tile until the working set fits the per-chip budget.
    while (_footprint_bytes(tm, tf_eff, d_model, x_isz, w_isz, o_isz,
                            use_scratch and not resident) > budget
           and tm > sub):
        tm = max(sub, _round_up(tm // 2, sub))

    return FFNPlan(d_model, d_ff, d_ff_p, int(tm), int(tf_eff), bool(resident),
                   sub, budget, bool(two_core),
                   None if compute_dtype is None else jnp.dtype(compute_dtype).name)


def prepare_ffn_weights(w1, w3, w2, plan: FFNPlan):
    """One-time weight prep -- keep this OUT of the per-token hot path.

    Fuses W1/W3 into an interleaved [d_model, 2*d_ff_p] matrix such that the
    j-th streamed tile of width 2*tf is [W1[:, j*tf:(j+1)*tf] | W3[:, same]],
    pads d_ff once if the tile does not divide it, and optionally casts to the
    MXU compute dtype.
    """
    d_model, d_ff = plan.d_model, plan.d_ff
    assert w1.shape == (d_model, d_ff) and w3.shape == (d_model, d_ff)
    assert w2.shape == (d_ff, d_model)
    if plan.compute_dtype is not None:
        dt = jnp.dtype(plan.compute_dtype)
        w1, w3, w2 = w1.astype(dt), w3.astype(dt), w2.astype(dt)
    if plan.d_ff_p != d_ff:
        pad = plan.d_ff_p - d_ff          # zero columns/rows contribute zero
        w1 = jnp.pad(w1, ((0, 0), (0, pad)))
        w3 = jnp.pad(w3, ((0, 0), (0, pad)))
        w2 = jnp.pad(w2, ((0, pad), (0, 0)))
    n_tf = plan.d_ff_p // plan.tf
    w13 = jnp.concatenate(
        [w1.reshape(d_model, n_tf, plan.tf),
         w3.reshape(d_model, n_tf, plan.tf)],
        axis=2).reshape(d_model, 2 * plan.d_ff_p)
    return w13, w2


# ----------------------------------------------------------------------------
# Kernels
# ----------------------------------------------------------------------------
def _ffn_resident_kernel(x_ref, w13_ref, w2_ref, o_ref):
    # Weights fully resident: single fused matmul + SwiGLU + output projection.
    d_ff = w2_ref.shape[0]
    h13 = jnp.dot(x_ref[...], w13_ref[...], preferred_element_type=jnp.float32)
    h1, h3 = h13[:, :d_ff], h13[:, d_ff:]
    h = (h1 * jax.nn.sigmoid(h1) * h3).astype(w2_ref.dtype)
    o_ref[...] = jnp.dot(h, w2_ref[...],
                         preferred_element_type=jnp.float32).astype(o_ref.dtype)


def _make_streamed_kernel(use_scratch: bool):
    def kernel(x_ref, w13_ref, w2_ref, o_ref, *scratch):
        # When the output is f32, accumulate directly into the resident output
        # block (saves a (tm, d_model) f32 scratch + final copy).
        acc_ref = scratch[0] if use_scratch else o_ref
        j = pl.program_id(1)

        @pl.when(j == 0)
        def _():
            acc_ref[...] = jnp.zeros_like(acc_ref)

        tf = w2_ref.shape[0]
        # One fused (tm, d_model) x (d_model, 2*tf) matmul for both branches.
        h13 = jnp.dot(x_ref[...], w13_ref[...],
                      preferred_element_type=jnp.float32)
        h1, h3 = h13[:, :tf], h13[:, tf:]
        h = (h1 * jax.nn.sigmoid(h1) * h3).astype(w2_ref.dtype)
        acc_ref[...] += jnp.dot(h, w2_ref[...],
                                preferred_element_type=jnp.float32
                                ).astype(acc_ref.dtype)

        if use_scratch:
            @pl.when(j == pl.num_programs(1) - 1)
            def _():
                o_ref[...] = acc_ref[...].astype(o_ref.dtype)

    return kernel


# ----------------------------------------------------------------------------
# Forward
# ----------------------------------------------------------------------------
@functools.partial(jax.jit, static_argnames=("plan",))
def feedforward_prepared(x, w13, w2, plan: FFNPlan):
    """x: [B, S, d_model]; w13: [d_model, 2*d_ff_p]; w2: [d_ff_p, d_model]."""
    B, S, d_model = x.shape
    assert d_model == plan.d_model
    assert w13.shape == (plan.d_model, 2 * plan.d_ff_p)
    assert w2.shape == (plan.d_ff_p, plan.d_model)
    out_dtype = x.dtype
    M = B * S

    if plan.compute_dtype is not None:
        x = x.astype(jnp.dtype(plan.compute_dtype))

    tm_eff = min(plan.tm, _round_up(M, plan.sub))
    Mp = _round_up(M, tm_eff)
    # 2-TC chips (v7x): keep the parallel token-tile count even so neither
    # core idles for a full tile.
    if plan.two_core_chip and Mp // tm_eff > 1 and (Mp // tm_eff) % 2 == 1:
        Mp += tm_eff

    x2d = x.reshape(M, d_model)
    if Mp != M:
        x2d = jnp.pad(x2d, ((0, Mp - M), (0, 0)))

    grid_i = Mp // tm_eff
    x_isz = jnp.dtype(x2d.dtype).itemsize
    w_isz = jnp.dtype(w13.dtype).itemsize
    o_isz = jnp.dtype(out_dtype).itemsize
    weight_bytes = (w13.size + w2.size) * w_isz

    if plan.resident:
        kernel = _ffn_resident_kernel
        grid = (grid_i,)
        in_specs = [
            pl.BlockSpec((tm_eff, d_model), lambda i: (i, 0)),
            # Constant block index -> weights DMA'd once, stay resident.
            pl.BlockSpec((d_model, 2 * plan.d_ff_p), lambda i: (0, 0)),
            pl.BlockSpec((plan.d_ff_p, d_model), lambda i: (0, 0)),
        ]
        out_specs = pl.BlockSpec((tm_eff, d_model), lambda i: (i, 0))
        scratch_shapes = []
        dim_sem = ("parallel",)
        weight_passes = 1
    else:
        use_scratch = jnp.dtype(out_dtype) != jnp.dtype(jnp.float32)
        kernel = _make_streamed_kernel(use_scratch)
        grid = (grid_i, plan.d_ff_p // plan.tf)
        in_specs = [
            pl.BlockSpec((tm_eff, d_model), lambda i, j: (i, 0)),
            pl.BlockSpec((d_model, 2 * plan.tf), lambda i, j: (0, j)),
            pl.BlockSpec((plan.tf, d_model), lambda i, j: (j, 0)),
        ]
        out_specs = pl.BlockSpec((tm_eff, d_model), lambda i, j: (i, 0))
        scratch_shapes = ([pltpu.VMEM((tm_eff, d_model), jnp.float32)]
                          if use_scratch else [])
        dim_sem = ("parallel", "arbitrary")
        weight_passes = grid_i  # weights are re-streamed once per token tile

    cost = pl.CostEstimate(
        flops=6 * Mp * d_model * plan.d_ff_p,
        transcendentals=Mp * plan.d_ff_p,
        bytes_accessed=int(Mp * d_model * (x_isz + o_isz)
                           + weight_bytes * weight_passes),
    )

    out2d = pl.pallas_call(
        kernel,
        out_shape=jax.ShapeDtypeStruct((Mp, d_model), out_dtype),
        grid_spec=pltpu.PrefetchScalarGridSpec(
            num_scalar_prefetch=0,
            grid=grid,
            in_specs=in_specs,
            out_specs=out_specs,
            scratch_shapes=scratch_shapes,
        ),
        compiler_params=pltpu.CompilerParams(
            dimension_semantics=dim_sem,
            vmem_limit_bytes=int(plan.vmem_budget),
        ),
        cost_estimate=cost,
    )(x2d, w13, w2)

    if Mp != M:
        out2d = out2d[:M]
    return out2d.reshape(B, S, d_model)
    # TODO(synk): dropout is identity (eval mode); training-mode dropout would
    # mask here with pltpu.prng_seed / pltpu.prng_random_bits.


def feedforward(x, w1, w3, w2, *, tm=None, tf=None, resident=None,
                compute_dtype=None):
    """One-shot convenience wrapper.

    For repeated calls with the same weights, build the plan and prepared
    weights ONCE (make_ffn_plan + prepare_ffn_weights) and call
    feedforward_prepared() so the weight fuse/pad/cast stays out of the
    per-token hot path.
    """
    plan = make_ffn_plan(x.shape[-1], w1.shape[1], x_dtype=x.dtype,
                         w_dtype=w1.dtype, tm=tm, tf=tf, resident=resident,
                         compute_dtype=compute_dtype)
    w13, w2p = prepare_ffn_weights(w1, w3, w2, plan)
    return feedforward_prepared(x, w13, w2p, plan)


# ----------------------------------------------------------------------------
# Reference + tests
# ----------------------------------------------------------------------------
def _reference(x, w1, w3, w2):
    h1 = jnp.dot(x, w1, preferred_element_type=jnp.float32)
    h3 = jnp.dot(x, w3, preferred_element_type=jnp.float32)
    h = (jax.nn.silu(h1) * h3).astype(w2.dtype)
    return jnp.dot(h, w2, preferred_element_type=jnp.float32).astype(x.dtype)


def _make_params(key, d_model, d_ff, dtype=jnp.float32):
    k1, k3, k2 = jax.random.split(key, 3)
    b_in = 1.0 / d_model ** 0.5
    b_ff = 1.0 / d_ff ** 0.5
    w1 = jax.random.uniform(k1, (d_model, d_ff), dtype, -b_in, b_in)
    w3 = jax.random.uniform(k3, (d_model, d_ff), dtype, -b_in, b_in)
    w2 = jax.random.uniform(k2, (d_ff, d_model), dtype, -b_ff, b_ff)
    return w1, w3, w2


if __name__ == "__main__":
    key = jax.random.PRNGKey(0)

    # --- Test 1: small module-like shapes, resident-weights fast path ------
    k_x, k_w = jax.random.split(key)
    B, S, d_model, d_ff = 2, 8, 32, 64
    x = jax.random.normal(k_x, (B, S, d_model), dtype=jnp.float32)
    w1, w3, w2 = _make_params(k_w, d_model, d_ff)
    out = jax.block_until_ready(feedforward(x, w1, w3, w2))
    ref = _reference(x, w1, w3, w2)
    assert out.shape == (B, S, d_model)
    assert jnp.allclose(out, ref, atol=1e-5, rtol=1e-5)

    # --- Test 2: resident path with M padding, prepare-once usage ----------
    k_x2, k_w2_ = jax.random.split(jax.random.PRNGKey(1))
    B2, S2, dm2, dff2 = 2, 37, 128, 384          # M = 74 (padded tokens)
    x2 = jax.random.normal(k_x2, (B2, S2, dm2), dtype=jnp.float32)
    w1b, w3b, w2b = _make_params(k_w2_, dm2, dff2)
    plan2 = make_ffn_plan(dm2, dff2, x_dtype=x2.dtype, w_dtype=w1b.dtype)
    w13b, w2bp = prepare_ffn_weights(w1b, w3b, w2b, plan2)   # once, off hot path
    out2 = jax.block_until_ready(feedforward_prepared(x2, w13b, w2bp, plan2))
    ref2 = _reference(x2, w1b, w3b, w2b)
    assert out2.shape == (B2, S2, dm2)
    assert jnp.allclose(out2, ref2, atol=1e-3, rtol=1e-3)

    # --- Test 3: forced streamed path (d_ff tiling + f32 acc into o_ref) ---
    out3 = jax.block_until_ready(
        feedforward(x2, w1b, w3b, w2b, tm=64, tf=128, resident=False))
    assert out3.shape == (B2, S2, dm2)
    assert jnp.allclose(out3, ref2, atol=1e-3, rtol=1e-3)

    # --- Test 4: bf16 storage, streamed path with f32 scratch accumulator --
    k_x4, k_w4 = jax.random.split(jax.random.PRNGKey(2))
    B4, S4, dm4, dff4 = 2, 24, 128, 256
    x4 = jax.random.normal(k_x4, (B4, S4, dm4), jnp.float32).astype(jnp.bfloat16)
    w1c, w3c, w2c = _make_params(k_w4, dm4, dff4)
    w1c, w3c, w2c = (w.astype(jnp.bfloat16) for w in (w1c, w3c, w2c))
    out4 = jax.block_until_ready(
        feedforward(x4, w1c, w3c, w2c, tm=64, tf=128, resident=False))
    ref4 = _reference(x4, w1c, w3c, w2c)
    assert out4.shape == (B4, S4, dm4)
    assert jnp.allclose(out4.astype(jnp.float32), ref4.astype(jnp.float32),
                        atol=3e-2, rtol=3e-2)

    print("KERNEL_OK")
</pallas_src>

<mosaic_0001>
module attributes {stable_mosaic.version = 11 : i64} {
  func.func @_ffn_resident_kernel(%arg0: i32, %arg1: memref<16x32xf32, #tpu.memory_space<vmem>>, %arg2: memref<32x128xf32, #tpu.memory_space<vmem>>, %arg3: memref<64x32xf32, #tpu.memory_space<vmem>>, %arg4: memref<16x32xf32, #tpu.memory_space<vmem>>) attributes {dimension_semantics = [#tpu.dimension_semantics<parallel>], iteration_bounds = array<i64: 1>, scalar_prefetch = 0 : i64, scratch_operands = 0 : i64, tpu.core_type = #tpu.core_type<tc>, window_params = [{transform_indices = @transform_0, window_bounds = array<i64: 16, 32>}, {pipeline_mode = #tpu.pipeline_mode<synchronous>, transform_indices = @transform_1, window_bounds = array<i64: 32, 128>}, {pipeline_mode = #tpu.pipeline_mode<synchronous>, transform_indices = @transform_2, window_bounds = array<i64: 64, 32>}, {transform_indices = @transform_3, window_bounds = array<i64: 16, 32>}]} {
    %c0 = arith.constant 0 : index
    %c0_0 = arith.constant 0 : index
    %0 = vector.load %arg1[%c0, %c0_0] : memref<16x32xf32, #tpu.memory_space<vmem>>, vector<16x32xf32>
    %c0_1 = arith.constant 0 : index
    %c0_2 = arith.constant 0 : index
    %1 = vector.load %arg2[%c0_1, %c0_2] : memref<32x128xf32, #tpu.memory_space<vmem>>, vector<32x128xf32>
    %cst = arith.constant dense<0.000000e+00> : vector<16x128xf32>
    %2 = tpu.matmul %0, %1, %cst {dimension_numbers = #tpu.dot_dimension_numbers<[1], [0], [0], [1], [0, 0, 1, 1], [], []>} : vector<16x32xf32>, vector<32x128xf32>, vector<16x128xf32> -> vector<16x128xf32>
    %3 = vector.extract_strided_slice %2 {offsets = [0, 0], sizes = [16, 64], strides = [1, 1]} : vector<16x128xf32> to vector<16x64xf32>
    %4 = vector.extract_strided_slice %2 {offsets = [0, 64], sizes = [16, 64], strides = [1, 1]} : vector<16x128xf32> to vector<16x64xf32>
    %5 = arith.negf %3 : vector<16x64xf32>
    %6 = math.exp %5 : vector<16x64xf32>
    %cst_3 = arith.constant 1.000000e+00 : f32
    %7 = vector.broadcast %cst_3 : f32 to vector<16x64xf32>
    %8 = arith.addf %7, %6 : vector<16x64xf32>
    %9 = arith.divf %7, %8 : vector<16x64xf32>
    %10 = arith.mulf %3, %9 : vector<16x64xf32>
    %11 = arith.mulf %10, %4 : vector<16x64xf32>
    %c0_4 = arith.constant 0 : index
    %c0_5 = arith.constant 0 : index
    %12 = vector.load %arg3[%c0_4, %c0_5] : memref<64x32xf32, #tpu.memory_space<vmem>>, vector<64x32xf32>
    %cst_6 = arith.constant dense<0.000000e+00> : vector<16x32xf32>
    %13 = tpu.matmul %11, %12, %cst_6 {dimension_numbers = #tpu.dot_dimension_numbers<[1], [0], [0], [1], [0, 0, 1, 1], [], []>} : vector<16x64xf32>, vector<64x32xf32>, vector<16x32xf32> -> vector<16x32xf32>
    %c0_7 = arith.constant 0 : index
    %c0_8 = arith.constant 0 : index
    %14 = vector.load %arg4[%c0_7, %c0_8] : memref<16x32xf32, #tpu.memory_space<vmem>>, vector<16x32xf32>
    tpu.vector_store %arg4[%c0_7, %c0_8], %13 {strides = array<i32>} : memref<16x32xf32, #tpu.memory_space<vmem>>, vector<16x32xf32>,
    return
  }
  func.func @transform_0(%arg0: i32) -> (i32, i32) {
    %c0_i32 = arith.constant 0 : i32
    %c0_i32_0 = arith.constant 0 : i32
    return %arg0, %c0_i32 : i32, i32
  }
  func.func @transform_1(%arg0: i32) -> (i32, i32) {
    %c0_i32 = arith.constant 0 : i32
    %c0_i32_0 = arith.constant 0 : i32
    %c0_i32_1 = arith.constant 0 : i32
    return %c0_i32, %c0_i32_0 : i32, i32
  }
  func.func @transform_2(%arg0: i32) -> (i32, i32) {
    %c0_i32 = arith.constant 0 : i32
    %c0_i32_0 = arith.constant 0 : i32
    %c0_i32_1 = arith.constant 0 : i32
    return %c0_i32, %c0_i32_0 : i32, i32
  }
  func.func @transform_3(%arg0: i32) -> (i32, i32) {
    %c0_i32 = arith.constant 0 : i32
    %c0_i32_0 = arith.constant 0 : i32
    return %arg0, %c0_i32 : i32, i32
  }
}

</mosaic_0001>

<bundles_post_ra>
// kernel: feedforward_prepared.1
= control target key start
LH: loop header
LB: loop body
LE: loop exit
PB: predicated region body
PF: predicated region fallthrough
CT: control target
= control target key end

     0   :  { %8 = vsyncpa [#allocation3], 0  ;;  %s561_s0 = inlined_call_operand.hbm [shape: f32[16,32], index: 0, kind: input, shape index: {}]   ;;  %s562_s1 = inlined_call_operand.hbm [shape: f32[32,128], index: 1, kind: input, shape index: {}]   ;;  %s563_s2 = inlined_call_operand.hbm [shape: f32[64,32], index: 2, kind: input, shape index: {}]   ;;  %s564_s3 = inlined_call_operand.hbm [shape: f32[16,32], index: 3, kind: output, shape index: {}]  }
   0x1   :  { %9 = vsyncpa [#allocation6], 0 }
   0x2   :  { %10 = vsyncpa [#allocation4], 0  ;;  %s463_s12 = smov [#allocation5]   ;;  %s464_s14 = smov [#allocation2]  }
   0x3   :  { %s28_s13 = sshll.u32 %s463_s12, 4  ;;  %s16_s15 = sshll.u32 %s464_s14, 4  ;;  %s29_s13 = int_to_ptr.vmem [resolvable:$true] %s28_s13  ;;  %s490_s15 = int_to_ptr.vmem [resolvable:$true] %s16_s15 }
   0x4   :  { %s369_s18 = scalar_lea.hbm %s562_s1, 512 }
   0x5   :  { %p370_p0 = scmp.ne.s32.totalorder %s562_s1, %s369_s18  ;;  %p373_p1 = scmp.lt.u32.totalorder %s369_s18, %s562_s1 }
   0x7   :  { %p375_p2 = pnand %p373_p1, %p370_p0 }
   0x9   :  { %378 = shalt.err (!%p375_p2)
}
   0xa   :  { %s379_s23 = scalar_lea.vmem %s29_s13, 512  ;;  %p384_p4 = scmp.lt.s32.totalorder %s29_s13, %s29_s13 }
   0xb   :  { %p380_p3 = scmp.ne.s32.totalorder %s29_s13, %s379_s23  ;;  %p385_p5 = scmp.lt.s32.totalorder %s379_s23, %s379_s23 }
   0xd   :  { %p386_p6 = por %p385_p5, %p384_p4 }
   0xf   :  { %p387_p7 = pnand %p386_p6, %p380_p3 }
  0x11   :  { %390 = shalt.err (!%p387_p7)
}
  0x12   :  { %s465_s24 = smov 128   ;;  %s466_s25 = smov 8  }
  0x13   :  { %34 = dma.hbm_to_vmem [thread:$0]  %s562_s1, 512, %s29_s13, [#allocation6], %s465_s24, %s465_s24, %s466_s25  }
  0x14   :  { %s391_s30 = scalar_lea.hbm %s561_s0, 256 }
  0x15   :  { %p392_p8 = scmp.ne.s32.totalorder %s561_s0, %s391_s30  ;;  %p395_p9 = scmp.lt.u32.totalorder %s391_s30, %s561_s0 }
  0x17   :  { %p397_p10 = pnand %p395_p9, %p392_p8 }
  0x19   :  { %400 = shalt.err (!%p397_p10)
}
  0x1a   :  { %s401_s8 = scalar_lea.vmem %s490_s15, 256  ;;  %p406_p12 = scmp.lt.s32.totalorder %s490_s15, %s490_s15 }
  0x1b   :  { %p402_p11 = scmp.ne.s32.totalorder %s490_s15, %s401_s8  ;;  %p407_p13 = scmp.lt.s32.totalorder %s401_s8, %s401_s8 }
  0x1d   :  { %p408_p0 = por %p407_p13, %p406_p12 }
  0x1f   :  { %p409_p1 = pnand %p408_p0, %p402_p11 }
  0x21   :  { %412 = shalt.err (!%p409_p1)
}
  0x22   :  { %22 = dma.hbm_to_vmem [thread:$0]  %s561_s0, 256, %s490_s15, [#allocation3], %s465_s24, %s465_s24, %s466_s25  }
  0x23   :  { %s467_s10 = smov [#allocation7]   ;;  %s413_s14 = scalar_lea.hbm %s563_s2, 1024 }
  0x24   :  { %s40_s11 = sshll.u32 %s467_s10, 4  ;;  %p414_p2 = scmp.ne.s32.totalorder %s563_s2, %s413_s14  ;;  %s41_s11 = int_to_ptr.vmem [resolvable:$true] %s40_s11 }
  0x25   :  { %p417_p3 = scmp.lt.u32.totalorder %s413_s14, %s563_s2 }
  0x27   :  { %p419_p4 = pnand %p417_p3, %p414_p2 }
  0x29   :  { %422 = shalt.err (!%p419_p4)
}
  0x2a   :  { %s423_s20 = scalar_lea.vmem %s41_s11, 1024  ;;  %p428_p6 = scmp.lt.s32.totalorder %s41_s11, %s41_s11 }
  0x2b   :  { %p424_p5 = scmp.ne.s32.totalorder %s41_s11, %s423_s20  ;;  %p429_p7 = scmp.lt.s32.totalorder %s423_s20, %s423_s20 }
  0x2d   :  { %p430_p8 = por %p429_p7, %p428_p6 }
  0x2f   :  { %p431_p9 = pnand %p430_p8, %p424_p5 }
  0x31   :  { %434 = shalt.err (!%p431_p9)
}
  0x32   :  { %46 = dma.hbm_to_vmem [thread:$0]  %s563_s2, 1024, %s41_s11, [#allocation6], %s465_s24, %s465_s24, %s466_s25  }
  0x33   :  { %457 = dma.done.wait [#allocation3], 256  }
  0x34   :  { %458 = vsyncadd [#allocation3], 4294967040 }
  0x35   :  { %459 = dma.done.wait [#allocation6], 1536  }
  0x36   :  { %460 = vsyncadd [#allocation6], 4294965760  ;;  %vm62_vm0 = vcmask 261120   ;;  %v58_v0 = vld [vmem:[#allocation5] sm:$0xff]  ;;  %v59_v1 = vld [vmem:[#allocation5 + $0x8] sm:$0xff]  ;;  %s468_s2 = smov 64  }
  0x37   :  { %v60_v2 = vld [vmem:[#allocation5 + $0x10] sm:$0xff]  ;;  %v330_v3 = vpack.c.bf16 %v59_v1, %v58_v0  ;;  %v61_v4 = vld [vmem:[#allocation5 + $0x18] sm:$0xff]  ;;  %v168_v8 = vld [vmem:[#allocation7] sm:$0xff]  ;;  %vm176_vm1 = vcmask 523264   ;;  %s469_s21 = smov [#allocation8]  }
  0x38   :  { %v56_v5 = vld [vmem:[#allocation2] sm:$0xff]  ;;  %v334_v6 = vpack.c.bf16 %v61_v4, %v60_v2  ;;  %v57_v7 = vld [vmem:[#allocation2 + $0x8] sm:$0xff]  ;;  %v169_v9 = vld [vmem:[#allocation7 + $0x8] sm:$0xff]  ;;  %s265_s22 = sshll.u32 %s469_s21, 4  ;;  %s266_s22 = int_to_ptr.vmem [resolvable:$true] %s265_s22 }
  0x39   :  { %308 = vmatprep.mubr.msk.f32.mxu0 %vm62_vm0, %v56_v5  ;;  %331 = vmatprep.subr.bf16.mxu0 %v330_v3  ;;  %v170_v10 = vld [vmem:[#allocation7 + $0x10] sm:$0xff]  ;;  %v338_v11 = vpack.c.bf16 %v169_v9, %v168_v8  ;;  %v171_v12 = vld [vmem:[#allocation7 + $0x18] sm:$0xff]  ;;  %v172_v14 = vld [vmem:[#allocation7 + $0x20] sm:$0xff]  ;;  %s435_s23 = scalar_lea.vmem %s266_s22, 256  ;;  %p440_p11 = scmp.lt.s32.totalorder %s266_s22, %s266_s22 }
  0x3a   :  { %333 = vmatpush3.bf16.msra.mxu0 %v330_v3  ;;  %v342_v13 = vpack.c.bf16 %v171_v12, %v170_v10  ;;  %v173_v15 = vld [vmem:[#allocation7 + $0x28] sm:$0xff]  ;;  %v174_v17 = vld [vmem:[#allocation7 + $0x30] sm:$0xff]  ;;  %v175_v18 = vld [vmem:[#allocation7 + $0x38] sm:$0xff]  ;;  %p436_p10 = scmp.ne.s32.totalorder %s266_s22, %s435_s23  ;;  %p441_p12 = scmp.lt.s32.totalorder %s435_s23, %s435_s23 }
  0x3b   :  { %335 = vmatprep.subr.bf16.mxu0 %v334_v6  ;;  %339 = vmatprep.subr.bf16.mxu1 %v338_v11  ;;  %v346_v16 = vpack.c.bf16 %v173_v15, %v172_v14  ;;  %v350_v19 = vpack.c.bf16 %v175_v18, %v174_v17 }
  0x3c   :  { %341 = vmatpush3.bf16.msra.mxu1 %v338_v11  ;;  %p442_p13 = por %p441_p12, %p440_p11 }
  0x3d   :  { %343 = vmatprep.subr.bf16.mxu1 %v342_v13 }
  0x3e   :  { %337 = vmatpush3.bf16.msra.mxu0 %v334_v6  ;;  %p443_p0 = pnand %p442_p13, %p436_p10 }
  0x40   :  { %345 = vmatpush3.bf16.msra.mxu1 %v342_v13 }
  0x41   :  { %309 = vmatmul.mubr.msk.f32.vlgmr.msra.gmra.mrb[0].mxu0 %vm62_vm0, %v57_v7  ;;  %347 = vmatprep.subr.bf16.mxu1 %v346_v16 }
  0x44   :  { %349 = vmatpush3.bf16.msra.mxu1 %v346_v16 }
  0x45   :  { %351 = vmatprep.subr.bf16.mxu1 %v350_v19 }
  0x48   :  { %353 = vmatpush3.bf16.msra.mxu1 %v350_v19 }
 0x114   :  { %v310_v20 = vpop.f32.mrb[0].mxu0 }
 0x115   :  { %v135_v21 = vpop.f32.mrb[1].mxu0  ;;  %v281_v23 = vmul.f32 -1.442695, %v310_v20 }
 0x116   :  { %160 = vrot.lane.b32.xlu0 %v135_v21, %s468_s2  ;;  %v280_v22 = vmul.f32 -1.442695, %v135_v21 }
 0x118   :  { %361 = vpow2.f32 %v280_v22 }
 0x119   :  { %363 = vpow2.f32 %v281_v23 }
 0x11a   :  { %162 = vrot.lane.b32.xlu0 %v310_v20, %s468_s2 }
 0x122   :  { %v362_v24 = vpop.eup %361 }
 0x123   :  { %v150_v25 = vadd.f32 1.0, %v362_v24  ;;  %v364_v26 = vpop.eup %363 }
 0x124   :  { %v151_v27 = vadd.f32 1.0, %v364_v26 }
 0x125   :  { %365 = vrcp.f32 %v150_v25 }
 0x126   :  { %367 = vrcp.f32 %v151_v27 }
 0x12f   :  { %v366_v28 = vpop.eup %365 }
 0x130   :  { %v156_v29 = vmul.f32 %v366_v28, %v135_v21  ;;  %v368_v30 = vpop.eup %367 }
 0x131   :  { %v157_v33 = vmul.f32 %v368_v30, %v310_v20 }
 0x188   :  { %v161_v31 = vpop.permute.xlu0 %160 }
 0x189   :  { %v166_v32 = vmul.f32 %v161_v31, %v156_v29 }
 0x18b   :  { %327 = vmatprep.mubr.msk.f32.mxu1 %vm176_vm1, %v166_v32 }
 0x18c   :  { %v163_v34 = vpop.permute.xlu0 %162 }
 0x18d   :  { %v167_v35 = vmul.f32 %v163_v34, %v157_v33 }
 0x18f   :  { %328 = vmatmul.mubr.msk.f32.vlgmr.msra.gmra.mrb[0].mxu1 %vm176_vm1, %v167_v35 }
 0x262   :  { %v329_v36 = vpop.f32.mrb[0].mxu1 }
 0x263   :  { %259 = vst.msk [vmem:[#allocation8 + $0x8] sm:$0xff] %vm62_vm0, %v329_v36  ;;  %v249_v37 = vpop.f32.mrb[1].mxu1 }
 0x264   :  { %258 = vst.msk [vmem:[#allocation8] sm:$0xff] %vm62_vm0, %v249_v37 }
 0x265   :  { %446 = shalt.err (!%p443_p0)
}
 0x266   :  { %s447_s28 = scalar_lea.hbm %s564_s3, 256 }
 0x267   :  { %p448_p1 = scmp.ne.s32.totalorder %s564_s3, %s447_s28  ;;  %p451_p2 = scmp.lt.u32.totalorder %s447_s28, %s564_s3 }
 0x269   :  { %p453_p3 = pnand %p451_p2, %p448_p1 }
 0x26b   :  { %456 = shalt.err (!%p453_p3)
}
 0x26c   :  { %271 = dma.vmem_to_hbm [thread:$0]  %s266_s22, 256, %s564_s3, [#allocation4], %s465_s24, %s465_s24, %s466_s25  }
 0x26d   :  { %461 = dma.done.wait [#allocation4], 256  }
 0x26e   :  { %462 = vsyncadd [#allocation4], 4294967040 }
 0x26f   :  { %275 = vsyncpa [#allocation3], 1 }
 0x270   :  { %276 = vsyncpa [#allocation6], 1 }
 0x271   :  { %277 = vsyncpa [#allocation4], 1 }

</bundles_post_ra>
